<compile_context>
chip_gen: v6e
topology: v6e:2x2x1
jax: 0.10.0
libtpu: 0.0.40
codegen_flags: <defaults>
</compile_context>

<pallas_src>
import functools
import math

import jax
import jax.numpy as jnp
from jax.experimental import pallas as pl
from jax.experimental.pallas import tpu as pltpu


def _rmsnorm_kernel(x_ref, scale_ref, o_ref, *, eps, inv_d):
    # x_ref: (ROW_TILE, D), scale_ref: (1, D), o_ref: (ROW_TILE, D)
    x = x_ref[...].astype(jnp.float32)
    # sum-of-squares along lanes (XLU) * precomputed 1/D; rsqrt on the EUP.
    ms = jnp.sum(x * x, axis=-1, keepdims=True) * inv_d
    inv = jax.lax.rsqrt(ms + eps)
    scale = scale_ref[...].astype(jnp.float32)  # (1, D) broadcasts over rows
    o_ref[...] = (x * inv * scale).astype(o_ref.dtype)


def rms_norm(
    x,
    scale,
    *,
    eps=1e-6,
    io_vmem_budget_bytes=32 * 1024 * 1024,   # budget for 2 in + 2 out tiles
    vmem_limit_bytes=48 * 1024 * 1024,       # > v5e/v6e scoped default, < v7x physical
):
    """RMSNorm over the last dimension of x, scaled by `scale` (shape (dim,))."""
    orig_shape = x.shape
    dim = orig_shape[-1]
    rows = math.prod(orig_shape[:-1]) if len(orig_shape) > 1 else 1
    x2d = x.reshape(rows, dim)
    # Keep scale in its own (typically f32) dtype; it is upcast in-kernel.
    # NOTE: the PyTorch module casts scale to x.dtype first; keeping f32 is
    # bit-identical when dtypes already match and strictly more precise otherwise.
    scale2d = scale.reshape(1, dim)

    itemsize = jnp.dtype(x.dtype).itemsize
    # sublane packing granularity for the row (second-to-last) axis
    row_align = {4: 8, 2: 16, 1: 32}.get(itemsize, 8)

    # Size the row tile so 2 input + 2 output double-buffered tiles fit the
    # I/O VMEM budget (fits all of v5e / v6e / v7x with headroom for f32 temps).
    max_rows_by_vmem = io_vmem_budget_bytes // (4 * dim * itemsize)
    row_tile = max(row_align, min(1024, max_rows_by_vmem))
    rows_aligned = pl.cdiv(rows, row_align) * row_align
    row_tile = min(row_tile, rows_aligned)
    row_tile = max(row_align, (row_tile // row_align) * row_align)

    # Partial last block (rows % row_tile != 0) is handled by Pallas masked
    # writeback — no explicit pad/slice copies.
    grid = (pl.cdiv(rows, row_tile),)

    kernel = functools.partial(_rmsnorm_kernel, eps=float(eps), inv_d=1.0 / float(dim))

    out = pl.pallas_call(
        kernel,
        out_shape=jax.ShapeDtypeStruct((rows, dim), x.dtype),
        grid_spec=pltpu.PrefetchScalarGridSpec(
            num_scalar_prefetch=0,
            grid=grid,
            in_specs=[
                pl.BlockSpec((row_tile, dim), lambda i: (i, 0)),
                pl.BlockSpec((1, dim), lambda i: (0, 0)),  # grid-invariant: DMA'd once
            ],
            out_specs=pl.BlockSpec((row_tile, dim), lambda i: (i, 0)),
        ),
        compiler_params=pltpu.CompilerParams(
            dimension_semantics=("parallel",),  # shards rows across v7x's 2 TCs
            vmem_limit_bytes=vmem_limit_bytes,
        ),
    )(x2d, scale2d)

    return out.reshape(orig_shape)


def _rms_norm_ref(x, scale, eps=1e-6):
    x32 = x.astype(jnp.float32)
    ms = jnp.mean(x32 * x32, axis=-1, keepdims=True)
    return (x32 * jax.lax.rsqrt(ms + eps) * scale.astype(jnp.float32)).astype(x.dtype)


if __name__ == "__main__":
    key = jax.random.PRNGKey(0)
    k1, k2 = jax.random.split(key)

    batch, seq, hidden = 2, 8, 32
    x = jax.random.normal(k1, (batch, seq, hidden), dtype=jnp.float32)

    # RMSNorm.__init__(dim): scale = ones(dim); perturb deterministically so the
    # scale actually does something.
    scale = jnp.ones((hidden,), dtype=jnp.float32) + 0.1 * jnp.arange(
        hidden, dtype=jnp.float32
    ) / hidden

    y = rms_norm(x, scale)
    jax.block_until_ready(y)
    assert jnp.allclose(y, _rms_norm_ref(x, scale), atol=1e-5, rtol=1e-5), (
        "mismatch vs reference"
    )

    # exercise the masked partial last block (row count not a tile multiple)
    x2 = jax.random.normal(k2, (3, 5, hidden), dtype=jnp.float32)
    y2 = rms_norm(x2, scale)
    jax.block_until_ready(y2)
    assert jnp.allclose(y2, _rms_norm_ref(x2, scale), atol=1e-5, rtol=1e-5), (
        "mismatch vs reference (partial block)"
    )

    print("KERNEL_OK")
</pallas_src>

<mosaic_0001>
module attributes {stable_mosaic.version = 11 : i64} {
  func.func @_rmsnorm_kernel(%arg0: i32, %arg1: memref<16x32xf32, #tpu.memory_space<vmem>>, %arg2: memref<1x32xf32, #tpu.memory_space<vmem>>, %arg3: memref<16x32xf32, #tpu.memory_space<vmem>>) attributes {dimension_semantics = [#tpu.dimension_semantics<parallel>], iteration_bounds = array<i64: 1>, scalar_prefetch = 0 : i64, scratch_operands = 0 : i64, tpu.core_type = #tpu.core_type<tc>, window_params = [{transform_indices = @transform_0, window_bounds = array<i64: 16, 32>}, {pipeline_mode = #tpu.pipeline_mode<synchronous>, transform_indices = @transform_1, window_bounds = array<i64: 1, 32>}, {transform_indices = @transform_2, window_bounds = array<i64: 16, 32>}]} {
    %c0 = arith.constant 0 : index
    %c0_0 = arith.constant 0 : index
    %0 = vector.load %arg1[%c0, %c0_0] : memref<16x32xf32, #tpu.memory_space<vmem>>, vector<16x32xf32>
    %1 = arith.mulf %0, %0 : vector<16x32xf32>
    %cst = arith.constant dense<0.000000e+00> : vector<16xf32>
    %2 = vector.multi_reduction <add>, %1, %cst [1] : vector<16x32xf32> to vector<16xf32>
    %3 = vector.shape_cast %2 : vector<16xf32> to vector<16x1xf32>
    %cst_1 = arith.constant 3.125000e-02 : f32
    %4 = vector.broadcast %cst_1 : f32 to vector<16x1xf32>
    %5 = arith.mulf %3, %4 : vector<16x1xf32>
    %cst_2 = arith.constant 9.99999997E-7 : f32
    %6 = vector.broadcast %cst_2 : f32 to vector<16x1xf32>
    %7 = arith.addf %5, %6 : vector<16x1xf32>
    %8 = math.rsqrt %7 : vector<16x1xf32>
    %c0_3 = arith.constant 0 : index
    %c0_4 = arith.constant 0 : index
    %9 = vector.load %arg2[%c0_3, %c0_4] : memref<1x32xf32, #tpu.memory_space<vmem>>, vector<1x32xf32>
    %10 = vector.broadcast %8 : vector<16x1xf32> to vector<16x32xf32>
    %11 = arith.mulf %0, %10 : vector<16x32xf32>
    %12 = vector.broadcast %9 : vector<1x32xf32> to vector<16x32xf32>
    %13 = arith.mulf %11, %12 : vector<16x32xf32>
    %c0_5 = arith.constant 0 : index
    %c0_6 = arith.constant 0 : index
    %14 = vector.load %arg3[%c0_5, %c0_6] : memref<16x32xf32, #tpu.memory_space<vmem>>, vector<16x32xf32>
    tpu.vector_store %arg3[%c0_5, %c0_6], %13 {strides = array<i32>} : memref<16x32xf32, #tpu.memory_space<vmem>>, vector<16x32xf32>,
    return
  }
  func.func @transform_0(%arg0: i32) -> (i32, i32) {
    %c0_i32 = arith.constant 0 : i32
    %c0_i32_0 = arith.constant 0 : i32
    return %arg0, %c0_i32 : i32, i32
  }
  func.func @transform_1(%arg0: i32) -> (i32, i32) {
    %c0_i32 = arith.constant 0 : i32
    %c0_i32_0 = arith.constant 0 : i32
    %c0_i32_1 = arith.constant 0 : i32
    return %c0_i32, %c0_i32_0 : i32, i32
  }
  func.func @transform_2(%arg0: i32) -> (i32, i32) {
    %c0_i32 = arith.constant 0 : i32
    %c0_i32_0 = arith.constant 0 : i32
    return %arg0, %c0_i32 : i32, i32
  }
}

</mosaic_0001>

<bundles_post_ra>
// kernel: tpu_custom_call.1
= control target key start
LH: loop header
LB: loop body
LE: loop exit
PB: predicated region body
PF: predicated region fallthrough
CT: control target
= control target key end

     0   :  { %7 = vsyncpa [#allocation3], 0  ;;  %s164_s0 = inlined_call_operand.hbm [shape: f32[16,32], index: 0, kind: input, shape index: {}]   ;;  %s165_s1 = inlined_call_operand.vmem [shape: f32[1,32], index: 1, kind: input, shape index: {}]   ;;  %s166_s2 = inlined_call_operand.hbm [shape: f32[16,32], index: 2, kind: output, shape index: {}]  }
   0x1   :  { %8 = vsyncpa [#allocation4], 0  ;;  %s126_s9 = smov [#allocation2]  }
   0x2   :  { %s14_s10 = sshll.u32 %s126_s9, 4  ;;  %s15_s10 = int_to_ptr.vmem [resolvable:$true] %s14_s10 }
   0x3   :  { %s90_s11 = scalar_lea.vmem %s15_s10, 256  ;;  %p95_p1 = scmp.lt.s32.totalorder %s15_s10, %s15_s10 }
   0x4   :  { %p91_p0 = scmp.ne.s32.totalorder %s15_s10, %s90_s11  ;;  %p96_p2 = scmp.lt.s32.totalorder %s90_s11, %s90_s11 }
   0x6   :  { %p97_p3 = por %p96_p2, %p95_p1 }
   0x8   :  { %p98_p4 = pnand %p97_p3, %p91_p0 }
   0xa   :  { %101 = shalt.err (!%p98_p4)
}
   0xb   :  { %s127_s12 = smov 128   ;;  %s128_s13 = smov 8  }
   0xc   :  { %20 = dma.hbm_to_vmem [thread:$0]  %s164_s0, 256, %s15_s10, [#allocation3], %s127_s12, %s127_s12, %s128_s13  }
   0xd   :  { %122 = dma.done.wait [#allocation3], 256  }
   0xe   :  { %123 = vsyncadd [#allocation3], 4294967040  ;;  %v26_v0 = vld [vmem:[#allocation2] sm:$0xff]  ;;  %vm30_vm0 = vcmask 261120   ;;  %v27_v1 = vld [vmem:[#allocation2 + $0x8] sm:$0xff]  ;;  %s129_s17 = smov [#allocation5]  }
   0xf   :  { %v28_v2 = vmul.f32 %v26_v0, %v26_v0  ;;  %v29_v3 = vmul.f32 %v27_v1, %v27_v1  ;;  %v73_v13 = vld [vmem:[%s165_s1] ss:$0 sm:$0xff]  ;;  %s61_s18 = sshll.u32 %s129_s17, 4  ;;  %s62_s18 = int_to_ptr.vmem [resolvable:$true] %s61_s18 }
  0x10   :  { %s102_s19 = scalar_lea.vmem %s62_s18, 256  ;;  %p107_p6 = scmp.lt.s32.totalorder %s62_s18, %s62_s18 }
  0x11   :  { %v31_v4 = vsel %vm30_vm0, %v28_v2, 0.0  ;;  %v34_v5 = vsel %vm30_vm0, %v29_v3, 0.0  ;;  %p103_p5 = scmp.ne.s32.totalorder %s62_s18, %s102_s19  ;;  %p108_p7 = scmp.lt.s32.totalorder %s102_s19, %s102_s19 }
  0x12   :  { %32 = vadd.xlane.f32.xlu0 %v31_v4 }
  0x13   :  { %p109_p8 = por %p108_p7, %p107_p6 }
  0x15   :  { %p110_p9 = pnand %p109_p8, %p103_p5 }
  0x16   :  { %35 = vadd.xlane.f32.xlu0 %v34_v5 }
  0x9b   :  { %v33_v6 = vpop.xlane.xlu0 %32 }
  0x9c   :  { %v37_v7 = vmul.f32 0.03125, %v33_v6 }
  0x9e   :  { %v39_v8 = vadd.f32 1e-06, %v37_v7 }
  0x9f   :  { %v36_v9 = vpop.xlane.xlu0 %35 }
  0xa0   :  { %78 = vrsqrt.f32 %v39_v8  ;;  %v38_v10 = vmul.f32 0.03125, %v36_v9 }
  0xa2   :  { %v40_v11 = vadd.f32 1e-06, %v38_v10 }
  0xa4   :  { %80 = vrsqrt.f32 %v40_v11 }
  0xad   :  { %v79_v12 = vpop.eup %78 }
  0xae   :  { %v44_v14 = vmul.f32 %v79_v12, %v26_v0 }
  0xb0   :  { %v52_v15 = vmul.f32 %v73_v13, %v44_v14 }
  0xb1   :  { %v81_v16 = vpop.eup %80 }
  0xb2   :  { %v45_v17 = vmul.f32 %v81_v16, %v27_v1  ;;  %54 = vst.msk [vmem:[#allocation5] sm:$0xff] %vm30_vm0, %v52_v15 }
  0xb4   :  { %v53_v18 = vmul.f32 %v73_v13, %v45_v17 }
  0xb6   :  { %55 = vst.msk [vmem:[#allocation5 + $0x8] sm:$0xff] %vm30_vm0, %v53_v18 }
  0xb7   :  { %113 = shalt.err (!%p110_p9)
}
  0xb8   :  { %67 = dma.vmem_to_hbm [thread:$0]  %s62_s18, 256, %s166_s2, [#allocation4], %s127_s12, %s127_s12, %s128_s13  }
  0xb9   :  { %124 = dma.done.wait [#allocation4], 256  }
  0xba   :  { %125 = vsyncadd [#allocation4], 4294967040 }
  0xbb   :  { %71 = vsyncpa [#allocation3], 1 }
  0xbc   :  { %72 = vsyncpa [#allocation4], 1 }

</bundles_post_ra>
